<compile_context>
chip_gen: v7x
topology: tpu7x:2x2x1
jax: 0.10.0
libtpu: 0.0.40
codegen_flags: <defaults>
</compile_context>

<pallas_src>
import math

import numpy as np
import jax
import jax.numpy as jnp
from jax import lax
from jax.experimental import pallas as pl
from jax.experimental.pallas import tpu as pltpu


# ----------------------------------------------------------------------------
# Helpers
# ----------------------------------------------------------------------------
def _round_up(x, m):
    return ((x + m - 1) // m) * m


# Safe on all generations: raises v5e's 16 MiB scoped default, stays well inside
# v7x's 64 MiB physical VMEM.  M-tiles are <= 512 x ~32 x 4B, double-buffered.
_COMPILER_PARAMS = pltpu.CompilerParams(
    dimension_semantics=("parallel",),
    vmem_limit_bytes=32 * 1024 * 1024,
)

_DEFAULT_TM = 512  # rows per grid step once M is large (multiple of 8)


# ----------------------------------------------------------------------------
# Fused covariant layer kernel:
#   sigma-BN scale + SH-domain activation gate + complex conv (all l) + ReLU(l=0)
# ----------------------------------------------------------------------------
def _make_cov_layer_kernel(bn_scale, act_eps, relu_cols):
    def kernel(x_ref, g_ref, en_ref, w_ref, b_ref, o_ref):
        # TODO(synk): SphericalSigmaBN source not provided; eval-mode with unit
        # running sigma -> uniform 1/sqrt(1+eps) rescale (`update` flag ignored).
        x = x_ref[...] * bn_scale

        # TODO(synk): ScaleInvariantSphericalHarmonicsDomainActivation source not
        # provided; gate each enabled-l fragment by n/(n+eps) of its SH norm.
        # One MXU matmul against a static group-indicator matrix computes every
        # fragment's sum-of-squares at once (MXU is otherwise idle here).
        ss = jnp.dot(x * x, g_ref[...], preferred_element_type=jnp.float32)
        n = jnp.sqrt(ss + act_eps)
        gate = n * pl.reciprocal(n + act_eps, approx=True)     # EUP, nearly free
        x = x * jnp.where(en_ref[...] > 0.5, gate, 1.0)

        # SphHarmDistributedComplexConv2d (kernel_size=1): one block-diagonal
        # real-form complex matmul covering every l and both re/im at once.
        # TODO(synk): general kxk spatial kernels / skip_l0 path not implemented.
        y = jnp.dot(x, w_ref[...], preferred_element_type=jnp.float32) + b_ref[...]

        # ReLU on the l=0 output block only (first 2*tau_out[0] columns).
        ocol = lax.broadcasted_iota(jnp.int32, y.shape, 1)
        o_ref[...] = jnp.where(ocol < relu_cols, jnp.maximum(y, 0.0), y)

    return kernel


def cov_layer(x_slab, w, bias, gate_g, gate_en, bn_scale, act_eps, relu_cols,
              tm=_DEFAULT_TM):
    M, K = x_slab.shape
    N = w.shape[1]
    TM = min(tm, _round_up(M, 8))
    Mp = _round_up(M, TM)
    if Mp != M:  # row padding only kicks in at realistic (large-M) sizes
        x_slab = jnp.pad(x_slab, ((0, Mp - M), (0, 0)))
    out = pl.pallas_call(
        _make_cov_layer_kernel(bn_scale, act_eps, relu_cols),
        out_shape=jax.ShapeDtypeStruct((Mp, N), jnp.float32),
        grid=(Mp // TM,),
        in_specs=[
            pl.BlockSpec((TM, K), lambda i: (i, 0)),   # activations stream over M
            pl.BlockSpec((K, K), lambda i: (0, 0)),    # gate-group matrix (resident)
            pl.BlockSpec((1, K), lambda i: (0, 0)),    # enabled-column mask
            pl.BlockSpec((K, N), lambda i: (0, 0)),    # conv weight (resident)
            pl.BlockSpec((1, N), lambda i: (0, 0)),    # conv bias
        ],
        out_specs=pl.BlockSpec((TM, N), lambda i: (i, 0)),
        compiler_params=_COMPILER_PARAMS,
    )(x_slab, gate_g, gate_en, w, bias)
    return out[:M] if Mp != M else out


# ----------------------------------------------------------------------------
# Fused SED + DOA head kernel (single launch, single output slab)
# ----------------------------------------------------------------------------
def _make_heads_kernel():
    def kernel(x_ref, skip_ref, w1x_ref, w1s_ref, b1_ref, w2_ref, b2_ref,
               d_ref, gs_ref, o_ref):
        x = x_ref[...]                                   # (TM, 2*(tau0 + 3*nb_class))
        skip = skip_ref[...]                             # (TM, skip features)

        # SED head: eval-mode BatchNorm1d folded into fc_sed1 at init; dropout is
        # identity; the torch concat(main_l0, skip) is expressed as two matmuls so
        # no lane concatenation is needed (w1x has zero rows on the l>=1 columns).
        h = (jnp.dot(x, w1x_ref[...], preferred_element_type=jnp.float32)
             + jnp.dot(skip, w1s_ref[...], preferred_element_type=jnp.float32)
             + b1_ref[...])
        sed = jnp.dot(h, w2_ref[...], preferred_element_type=jnp.float32) + b2_ref[...]

        # DOA head (FirstOrderSpherical2UnitVector): the first-order SH -> Cartesian
        # map is linear, so it is one matmul against a static selection matrix; the
        # per-class squared norm is a block-of-ones matmul (MXU is idle), then rsqrt.
        # TODO(synk): module source not provided; standard complex-SH map
        #   x ~ Re(c_-1 - c_+1), y ~ -Im(c_-1 + c_+1), z ~ sqrt(2) Re(c_0).
        v = jnp.dot(x, d_ref[...], preferred_element_type=jnp.float32)   # (TM, 3C)
        n2 = jnp.dot(v * v, gs_ref[...], preferred_element_type=jnp.float32)
        # NOTE: for degenerate (all-zero) first-order coefficients the output is
        # not exactly unit-norm; matches the original module's behaviour.
        doa = v * lax.rsqrt(n2 + 1e-12)

        o_ref[...] = jnp.concatenate([sed, doa], axis=-1)  # (TM, C + 3C)

    return kernel


def heads(x_slab, skip_slab, w1x, w1s, b1, w2, b2, doa_d, doa_g, nb_class,
          tm=_DEFAULT_TM):
    M, K = x_slab.shape
    Ks = skip_slab.shape[1]
    N = nb_class + 3 * nb_class
    TM = min(tm, _round_up(M, 8))
    Mp = _round_up(M, TM)
    if Mp != M:
        x_slab = jnp.pad(x_slab, ((0, Mp - M), (0, 0)))
        skip_slab = jnp.pad(skip_slab, ((0, Mp - M), (0, 0)))
    out = pl.pallas_call(
        _make_heads_kernel(),
        out_shape=jax.ShapeDtypeStruct((Mp, N), jnp.float32),
        grid=(Mp // TM,),
        in_specs=[
            pl.BlockSpec((TM, K), lambda i: (i, 0)),
            pl.BlockSpec((TM, Ks), lambda i: (i, 0)),
            pl.BlockSpec(w1x.shape, lambda i: (0, 0)),
            pl.BlockSpec(w1s.shape, lambda i: (0, 0)),
            pl.BlockSpec((1, b1.shape[1]), lambda i: (0, 0)),
            pl.BlockSpec(w2.shape, lambda i: (0, 0)),
            pl.BlockSpec((1, b2.shape[1]), lambda i: (0, 0)),
            pl.BlockSpec(doa_d.shape, lambda i: (0, 0)),
            pl.BlockSpec(doa_g.shape, lambda i: (0, 0)),
        ],
        out_specs=pl.BlockSpec((TM, N), lambda i: (i, 0)),
        compiler_params=_COMPILER_PARAMS,
    )(x_slab, skip_slab, w1x, w1s, b1, w2, b2, doa_d, doa_g)
    return out[:M] if Mp != M else out


# ----------------------------------------------------------------------------
# Weight / constant assembly (done once at init; keeps kernels to pure matmuls)
# ----------------------------------------------------------------------------
def _block_diag(blocks):
    rows = sum(b.shape[0] for b in blocks)
    cols = sum(b.shape[1] for b in blocks)
    out = jnp.zeros((rows, cols), jnp.float32)
    r = c = 0
    for b in blocks:
        out = out.at[r:r + b.shape[0], c:c + b.shape[1]].set(b)
        r += b.shape[0]
        c += b.shape[1]
    return out


def _complex_block_weight(tau_in, tau_out, per_l):
    # Columns ordered (l, tau-channel, m, re/im); the per-l complex weight is
    # shared over the (2l+1) m-components.  Real form of y = x @ (wr + i*wi):
    #   [yr, yi] = [xr, xi] @ [[wr, wi], [-wi, wr]]
    blocks = []
    for l in range(len(tau_in)):
        ti, to = tau_in[l], tau_out[l]
        m = 2 * l + 1
        wr, wi = per_l[l]["w_re"], per_l[l]["w_im"]                 # (ti, to)
        A = jnp.stack([jnp.stack([wr, wi], axis=-1),
                       jnp.stack([-wi, wr], axis=-1)], axis=-2)     # (ti,to,p_in,p_out)
        eye = jnp.eye(m, dtype=jnp.float32)
        blk = jnp.einsum("ab,iopq->iapobq", eye, A)                 # (ti,m,2,to,m,2)
        blocks.append(blk.reshape(ti * m * 2, to * m * 2))
    return _block_diag(blocks)


def _conv_bias(tau_out, per_l):
    # TODO(synk): complex bias applied on the l=0 block only (equivariance).
    to0 = tau_out[0]
    b0 = jnp.stack([per_l[0]["b_re"], per_l[0]["b_im"]], axis=-1).reshape(-1)
    n_out = 2 * sum(t * (2 * l + 1) for l, t in enumerate(tau_out))
    bias = jnp.concatenate([b0, jnp.zeros((n_out - 2 * to0,), jnp.float32)])
    return bias[None, :]


def _gate_matrices(tau, l_use):
    # G[i, j] = 1 if columns i, j belong to the same enabled-(l, channel) fragment.
    K = 2 * sum(t * (2 * l + 1) for l, t in enumerate(tau))
    G = np.zeros((K, K), np.float32)
    en = np.zeros((1, K), np.float32)
    col = 0
    for l, t in enumerate(tau):
        w = 2 * (2 * l + 1)
        for _ in range(t):
            if l in l_use:
                G[col:col + w, col:col + w] = 1.0
                en[0, col:col + w] = 1.0
            col += w
    return jnp.asarray(G), jnp.asarray(en)


def _doa_matrices(nb_class, kmain, kfull):
    # First-order SH -> Cartesian is linear: V = x @ D, then per-class norm via a
    # block-of-ones matmul.  Column order inside the l=1 block of x is
    # (class, m, re/im) with m index 0->m=-1, 1->m=0, 2->m=+1.
    D = np.zeros((kfull, 3 * nb_class), np.float32)
    for c in range(nb_class):
        b = kmain + 6 * c
        D[b + 0, 3 * c + 0] = 1.0                  # +Re(c_-1)
        D[b + 4, 3 * c + 0] = -1.0                 # -Re(c_+1)
        D[b + 1, 3 * c + 1] = -1.0                 # -Im(c_-1)
        D[b + 5, 3 * c + 1] = -1.0                 # -Im(c_+1)
        D[b + 2, 3 * c + 2] = math.sqrt(2.0)       # sqrt(2) Re(c_0)
    G = np.zeros((3 * nb_class, 3 * nb_class), np.float32)
    for c in range(nb_class):
        G[3 * c:3 * c + 3, 3 * c:3 * c + 3] = 1.0
    return jnp.asarray(D), jnp.asarray(G)


# ----------------------------------------------------------------------------
# Model config + deterministic parameter init
# ----------------------------------------------------------------------------
def make_config():
    cfg = dict(
        nb_class=3,
        nb_layer=2,
        Lmax=1,
        nb_skip_bin=2,
        half_dense_feature=8,
        half_fc_feature=16,
        nb_skip_l0_features=[0, 2],
        taus_cgins=[[2, 2], [4, 2]],
        pooling_ns=[2, 2],
        cnn_paddings=[0, 0],
        cnn_kernel_sizes=[1, 1],
        cnn_skip_l0s=[False, False],
        sphharm_activation_enabled_ls=[[1], [1]],
        cgbilinear_eps=0.01,
        scale_equivariance=True,
        sphharmactivation_eps=1e-3,
        sphstdbatchnorm_momentum=0.1,
        sphstdbatchnorm_eps=1e-5,
        dropout=0.0,
        use_GRU=False,   # TODO(synk): nn.GRU branch not implemented (use_GRU=False only)
    )
    ladd = [0] * (cfg["Lmax"] + 1)
    ladd[0] = cfg["half_dense_feature"] - sum(cfg["nb_skip_l0_features"][1:]) * cfg["nb_skip_bin"]
    ladd[1] = cfg["nb_class"]
    cfg["taus_cgin"] = cfg["taus_cgins"] + [ladd]
    return cfg


def init_weights(cfg, key):
    keys = iter(jax.random.split(key, 64))
    weights = {"conv_w": [], "conv_b": [], "gate_G": [], "gate_en": []}
    for layer in range(cfg["nb_layer"]):
        tau_in = cfg["taus_cgin"][layer]          # TODO(synk): simplified CG -> tau_out == tau_in
        tau_out = cfg["taus_cgin"][layer + 1]
        per_l = []
        for l in range(cfg["Lmax"] + 1):
            ti, to = tau_in[l], tau_out[l]
            per_l.append(dict(
                w_re=0.3 * jax.random.normal(next(keys), (ti, to), jnp.float32),
                w_im=0.3 * jax.random.normal(next(keys), (ti, to), jnp.float32),
                b_re=0.1 * jax.random.normal(next(keys), (to,), jnp.float32),
                b_im=0.1 * jax.random.normal(next(keys), (to,), jnp.float32),
            ))
        weights["conv_w"].append(_complex_block_weight(tau_in, tau_out, per_l))
        weights["conv_b"].append(_conv_bias(tau_out, per_l))
        g, en = _gate_matrices(tau_in, cfg["sphharm_activation_enabled_ls"][layer])
        weights["gate_G"].append(g)
        weights["gate_en"].append(en)

    D = 2 * cfg["half_dense_feature"]
    H = 2 * cfg["half_fc_feature"]
    C = cfg["nb_class"]
    tau_last = cfg["taus_cgin"][-1]
    kmain = 2 * tau_last[0]
    kfull = 2 * (tau_last[0] + 3 * C)

    # bn_sed eval mode (running_mean=0, running_var=1) folded straight into fc_sed1.
    gamma = 1.0 + 0.1 * jax.random.normal(next(keys), (D,), jnp.float32)
    beta = 0.1 * jax.random.normal(next(keys), (D,), jnp.float32)
    bn_eps = 1e-5
    bn_g = gamma / jnp.sqrt(1.0 + bn_eps)
    fc1_w = 0.2 * jax.random.normal(next(keys), (D, H), jnp.float32)
    fc1_b = 0.1 * jax.random.normal(next(keys), (1, H), jnp.float32)
    w1 = fc1_w * bn_g[:, None]                               # w1' = diag(bn_g) @ w1
    b1 = beta[None, :] @ fc1_w + fc1_b                       # b1' = bn_b @ w1 + b1
    # Split: rows for the main l=0 features live on the full final slab (zero rows
    # for the l=1/DOA columns -> no lane slicing in the kernel); skip rows separate.
    w1x = jnp.zeros((kfull, H), jnp.float32).at[:kmain].set(w1[:kmain])
    weights["fc1_wx"] = w1x
    weights["fc1_ws"] = w1[kmain:]
    weights["fc1_b"] = b1
    weights["fc2_w"] = 0.2 * jax.random.normal(next(keys), (H, C), jnp.float32)
    weights["fc2_b"] = 0.1 * jax.random.normal(next(keys), (1, C), jnp.float32)
    weights["doa_D"], weights["doa_G"] = _doa_matrices(C, kmain, kfull)
    return weights


# ----------------------------------------------------------------------------
# Forward pass
# ----------------------------------------------------------------------------
def forward(cfg, weights, x, update=False):
    # TODO(synk): `update` (train-mode BN statistics update) ignored; eval mode.
    B = x.shape[0]
    assert x.shape[1] == 8 and x.shape[4] == 2
    # One-time persistent layout change: (B, C_sh, T, F, 2) -> (B, T, F, C_sh, 2),
    # so every layer's kernel input is a free reshape, no per-layer transposes.
    x = jnp.transpose(x, (0, 2, 3, 1, 4))

    bn_scale = 1.0 / math.sqrt(1.0 + cfg["sphstdbatchnorm_eps"])
    skipsl0 = []
    for layer in range(cfg["nb_layer"]):
        # TODO(synk): CGElementProduct source not provided; identity (tau_out == tau_in).
        tau_next = cfg["taus_cgin"][layer + 1]
        Bq, T, F, C, _ = x.shape
        x_slab = x.reshape(Bq * T * F, C * 2)
        y_slab = cov_layer(
            x_slab,
            weights["conv_w"][layer],
            weights["conv_b"][layer],
            weights["gate_G"][layer],
            weights["gate_en"][layer],
            bn_scale,
            cfg["sphharmactivation_eps"],
            2 * tau_next[0],
        )
        C_out = sum(t * (2 * l + 1) for l, t in enumerate(tau_next))
        x = y_slab.reshape(Bq, T, F, C_out, 2)
        # TODO(synk): GroupAvgPool1dBCTF2 source not provided; avg-pool along F
        # with kernel == stride == n.
        n = cfg["pooling_ns"][layer]
        x = x.reshape(Bq, T, F // n, n, C_out, 2).mean(axis=3)
        if layer < cfg["nb_layer"] - 1:
            nb_f_now = x.shape[2]
            fs_use = np.array(
                [i * nb_f_now // cfg["nb_skip_bin"] for i in range(cfg["nb_skip_bin"])],
                np.int32,
            )
            s = jnp.take(x[:, :, :, :cfg["nb_skip_l0_features"][layer + 1], :],
                         fs_use, axis=2)          # (B, T, F_sel, C_skip, 2)
            skipsl0.append(s)

    T_out = x.shape[1]
    tau_last = cfg["taus_cgin"][-1]
    assert x.shape[2] == 1  # final frequency dim must be 1 (matches torch reshape)

    # Skip features, reordered (channel, freq-bin, re/im) to match torch flattening.
    skip_parts = []
    for s in skipsl0:
        s = jnp.transpose(s, (0, 1, 3, 2, 4))     # (B, T_s, C_skip, F_sel, 2)
        t0 = (s.shape[1] - T_out) // 2
        skip_parts.append(s[:, t0:t0 + T_out].reshape(B, T_out, -1))
    skip_slab = jnp.concatenate(skip_parts, axis=-1).reshape(B * T_out, -1)

    x_slab = x.reshape(B * T_out, -1)             # (B*T, 2*(tau0 + 3*nb_class))
    assert 2 * tau_last[0] + skip_slab.shape[1] == 2 * cfg["half_dense_feature"]

    out = heads(
        x_slab, skip_slab,
        weights["fc1_wx"], weights["fc1_ws"], weights["fc1_b"],
        weights["fc2_w"], weights["fc2_b"],
        weights["doa_D"], weights["doa_G"],
        cfg["nb_class"],
    )
    x_sed = out[:, :cfg["nb_class"]].reshape(B, T_out, cfg["nb_class"])
    x_doa = out[:, cfg["nb_class"]:].reshape(B, T_out, cfg["nb_class"], 3)
    return x_sed, x_doa


# ----------------------------------------------------------------------------
if __name__ == "__main__":
    cfg = make_config()
    key = jax.random.PRNGKey(0)
    k_in, k_w = jax.random.split(key)

    # x: (B=2, C_sh=8 [tau=[2,2] -> 2 + 2*3], T=8, F=4, 2=re/im)
    x = jax.random.normal(k_in, (2, 8, 8, 4, 2), dtype=jnp.float32)
    weights = init_weights(cfg, k_w)

    fwd = jax.jit(lambda w, xx: forward(cfg, w, xx, update=False))
    x_sed, x_doa = fwd(weights, x)
    jax.block_until_ready((x_sed, x_doa))

    assert x_sed.shape == (2, 8, cfg["nb_class"])
    assert x_doa.shape == (2, 8, cfg["nb_class"], 3)
    assert bool(jnp.all(jnp.isfinite(x_sed))) and bool(jnp.all(jnp.isfinite(x_doa)))
    # DOA outputs must be unit vectors
    norms = jnp.linalg.norm(x_doa, axis=-1)
    assert bool(jnp.all(jnp.abs(norms - 1.0) < 1e-3))

    print("KERNEL_OK")
</pallas_src>

<mosaic_0001>
module attributes {stable_mosaic.version = 11 : i64} {
  func.func @kernel(%arg0: i32, %arg1: memref<64x16xf32, #tpu.memory_space<vmem>>, %arg2: memref<16x16xf32, #tpu.memory_space<vmem>>, %arg3: memref<1x16xf32, #tpu.memory_space<vmem>>, %arg4: memref<16x20xf32, #tpu.memory_space<vmem>>, %arg5: memref<1x20xf32, #tpu.memory_space<vmem>>, %arg6: memref<64x20xf32, #tpu.memory_space<vmem>>) attributes {dimension_semantics = [#tpu.dimension_semantics<parallel>], iteration_bounds = array<i64: 1>, scalar_prefetch = 0 : i64, scratch_operands = 0 : i64, tpu.core_type = #tpu.core_type<tc>, window_params = [{transform_indices = @transform_0, window_bounds = array<i64: 64, 16>}, {pipeline_mode = #tpu.pipeline_mode<synchronous>, transform_indices = @transform_1, window_bounds = array<i64: 16, 16>}, {pipeline_mode = #tpu.pipeline_mode<synchronous>, transform_indices = @transform_2, window_bounds = array<i64: 1, 16>}, {pipeline_mode = #tpu.pipeline_mode<synchronous>, transform_indices = @transform_3, window_bounds = array<i64: 16, 20>}, {pipeline_mode = #tpu.pipeline_mode<synchronous>, transform_indices = @transform_4, window_bounds = array<i64: 1, 20>}, {transform_indices = @transform_5, window_bounds = array<i64: 64, 20>}]} {
    %c0 = arith.constant 0 : index
    %c0_0 = arith.constant 0 : index
    %0 = vector.load %arg1[%c0, %c0_0] : memref<64x16xf32, #tpu.memory_space<vmem>>, vector<64x16xf32>
    %cst = arith.constant 0.999994993 : f32
    %1 = vector.broadcast %cst : f32 to vector<64x16xf32>
    %2 = arith.mulf %0, %1 : vector<64x16xf32>
    %3 = arith.mulf %2, %2 : vector<64x16xf32>
    %c0_1 = arith.constant 0 : index
    %c0_2 = arith.constant 0 : index
    %4 = vector.load %arg2[%c0_1, %c0_2] : memref<16x16xf32, #tpu.memory_space<vmem>>, vector<16x16xf32>
    %cst_3 = arith.constant dense<0.000000e+00> : vector<64x16xf32>
    %5 = tpu.matmul %3, %4, %cst_3 {dimension_numbers = #tpu.dot_dimension_numbers<[1], [0], [0], [1], [0, 0, 1, 1], [], []>} : vector<64x16xf32>, vector<16x16xf32>, vector<64x16xf32> -> vector<64x16xf32>
    %cst_4 = arith.constant 1.000000e-03 : f32
    %6 = vector.broadcast %cst_4 : f32 to vector<64x16xf32>
    %7 = arith.addf %5, %6 : vector<64x16xf32>
    %8 = math.sqrt %7 : vector<64x16xf32>
    %cst_5 = arith.constant 1.000000e-03 : f32
    %9 = vector.broadcast %cst_5 : f32 to vector<64x16xf32>
    %10 = arith.addf %8, %9 : vector<64x16xf32>
    %11 = tpu.reciprocal %10 {approx = true} : vector<64x16xf32> -> vector<64x16xf32>
    %12 = arith.mulf %8, %11 : vector<64x16xf32>
    %c0_6 = arith.constant 0 : index
    %c0_7 = arith.constant 0 : index
    %13 = vector.load %arg3[%c0_6, %c0_7] : memref<1x16xf32, #tpu.memory_space<vmem>>, vector<1x16xf32>
    %cst_8 = arith.constant 5.000000e-01 : f32
    %14 = vector.broadcast %cst_8 : f32 to vector<1x16xf32>
    %15 = arith.cmpf ogt, %13, %14 : vector<1x16xf32>
    %cst_9 = arith.constant 1.000000e+00 : f32
    %16 = vector.shape_cast %15 : vector<1x16xi1> to vector<1x16xi1>
    %17 = vector.broadcast %16 : vector<1x16xi1> to vector<64x16xi1>
    %18 = vector.broadcast %cst_9 : f32 to vector<64x16xf32>
    %19 = arith.select %17, %12, %18 : vector<64x16xi1>, vector<64x16xf32>
    %20 = arith.mulf %2, %19 : vector<64x16xf32>
    %c0_10 = arith.constant 0 : index
    %c0_11 = arith.constant 0 : index
    %21 = vector.load %arg4[%c0_10, %c0_11] : memref<16x20xf32, #tpu.memory_space<vmem>>, vector<16x20xf32>
    %cst_12 = arith.constant dense<0.000000e+00> : vector<64x20xf32>
    %22 = tpu.matmul %20, %21, %cst_12 {dimension_numbers = #tpu.dot_dimension_numbers<[1], [0], [0], [1], [0, 0, 1, 1], [], []>} : vector<64x16xf32>, vector<16x20xf32>, vector<64x20xf32> -> vector<64x20xf32>
    %c0_13 = arith.constant 0 : index
    %c0_14 = arith.constant 0 : index
    %23 = vector.load %arg5[%c0_13, %c0_14] : memref<1x20xf32, #tpu.memory_space<vmem>>, vector<1x20xf32>
    %24 = vector.broadcast %23 : vector<1x20xf32> to vector<64x20xf32>
    %25 = arith.addf %22, %24 : vector<64x20xf32>
    %26 = tpu.iota {dimensions = array<i32: 1>} : vector<64x20xi32>
    %c8_i32 = arith.constant 8 : i32
    %27 = vector.broadcast %c8_i32 : i32 to vector<64x20xi32>
    %28 = arith.cmpi slt, %26, %27 : vector<64x20xi32>
    %cst_15 = arith.constant 0.000000e+00 : f32
    %29 = vector.broadcast %cst_15 : f32 to vector<64x20xf32>
    %30 = arith.maximumf %25, %29 : vector<64x20xf32>
    %31 = arith.select %28, %30, %25 : vector<64x20xi1>, vector<64x20xf32>
    %c0_16 = arith.constant 0 : index
    %c0_17 = arith.constant 0 : index
    %32 = vector.load %arg6[%c0_16, %c0_17] : memref<64x20xf32, #tpu.memory_space<vmem>>, vector<64x20xf32>
    tpu.vector_store %arg6[%c0_16, %c0_17], %31 {strides = array<i32>} : memref<64x20xf32, #tpu.memory_space<vmem>>, vector<64x20xf32>,
    return
  }
  func.func @transform_0(%arg0: i32) -> (i32, i32) {
    %c0_i32 = arith.constant 0 : i32
    %c0_i32_0 = arith.constant 0 : i32
    return %arg0, %c0_i32 : i32, i32
  }
  func.func @transform_1(%arg0: i32) -> (i32, i32) {
    %c0_i32 = arith.constant 0 : i32
    %c0_i32_0 = arith.constant 0 : i32
    %c0_i32_1 = arith.constant 0 : i32
    return %c0_i32, %c0_i32_0 : i32, i32
  }
  func.func @transform_2(%arg0: i32) -> (i32, i32) {
    %c0_i32 = arith.constant 0 : i32
    %c0_i32_0 = arith.constant 0 : i32
    %c0_i32_1 = arith.constant 0 : i32
    return %c0_i32, %c0_i32_0 : i32, i32
  }
  func.func @transform_3(%arg0: i32) -> (i32, i32) {
    %c0_i32 = arith.constant 0 : i32
    %c0_i32_0 = arith.constant 0 : i32
    %c0_i32_1 = arith.constant 0 : i32
    return %c0_i32, %c0_i32_0 : i32, i32
  }
  func.func @transform_4(%arg0: i32) -> (i32, i32) {
    %c0_i32 = arith.constant 0 : i32
    %c0_i32_0 = arith.constant 0 : i32
    %c0_i32_1 = arith.constant 0 : i32
    return %c0_i32, %c0_i32_0 : i32, i32
  }
  func.func @transform_5(%arg0: i32) -> (i32, i32) {
    %c0_i32 = arith.constant 0 : i32
    %c0_i32_0 = arith.constant 0 : i32
    return %arg0, %c0_i32 : i32, i32
  }
}

module attributes {stable_mosaic.version = 11 : i64} {
  func.func @kernel(%arg0: i32, %arg1: memref<32x20xf32, #tpu.memory_space<vmem>>, %arg2: memref<20x20xf32, #tpu.memory_space<vmem>>, %arg3: memref<1x20xf32, #tpu.memory_space<vmem>>, %arg4: memref<20x26xf32, #tpu.memory_space<vmem>>, %arg5: memref<1x26xf32, #tpu.memory_space<vmem>>, %arg6: memref<32x26xf32, #tpu.memory_space<vmem>>) attributes {dimension_semantics = [#tpu.dimension_semantics<parallel>], iteration_bounds = array<i64: 1>, scalar_prefetch = 0 : i64, scratch_operands = 0 : i64, tpu.core_type = #tpu.core_type<tc>, window_params = [{transform_indices = @transform_0, window_bounds = array<i64: 32, 20>}, {pipeline_mode = #tpu.pipeline_mode<synchronous>, transform_indices = @transform_1, window_bounds = array<i64: 20, 20>}, {pipeline_mode = #tpu.pipeline_mode<synchronous>, transform_indices = @transform_2, window_bounds = array<i64: 1, 20>}, {pipeline_mode = #tpu.pipeline_mode<synchronous>, transform_indices = @transform_3, window_bounds = array<i64: 20, 26>}, {pipeline_mode = #tpu.pipeline_mode<synchronous>, transform_indices = @transform_4, window_bounds = array<i64: 1, 26>}, {transform_indices = @transform_5, window_bounds = array<i64: 32, 26>}]} {
    %c0 = arith.constant 0 : index
    %c0_0 = arith.constant 0 : index
    %0 = vector.load %arg1[%c0, %c0_0] : memref<32x20xf32, #tpu.memory_space<vmem>>, vector<32x20xf32>
    %cst = arith.constant 0.999994993 : f32
    %1 = vector.broadcast %cst : f32 to vector<32x20xf32>
    %2 = arith.mulf %0, %1 : vector<32x20xf32>
    %3 = arith.mulf %2, %2 : vector<32x20xf32>
    %c0_1 = arith.constant 0 : index
    %c0_2 = arith.constant 0 : index
    %4 = vector.load %arg2[%c0_1, %c0_2] : memref<20x20xf32, #tpu.memory_space<vmem>>, vector<20x20xf32>
    %cst_3 = arith.constant dense<0.000000e+00> : vector<32x20xf32>
    %5 = tpu.matmul %3, %4, %cst_3 {dimension_numbers = #tpu.dot_dimension_numbers<[1], [0], [0], [1], [0, 0, 1, 1], [], []>} : vector<32x20xf32>, vector<20x20xf32>, vector<32x20xf32> -> vector<32x20xf32>
    %cst_4 = arith.constant 1.000000e-03 : f32
    %6 = vector.broadcast %cst_4 : f32 to vector<32x20xf32>
    %7 = arith.addf %5, %6 : vector<32x20xf32>
    %8 = math.sqrt %7 : vector<32x20xf32>
    %cst_5 = arith.constant 1.000000e-03 : f32
    %9 = vector.broadcast %cst_5 : f32 to vector<32x20xf32>
    %10 = arith.addf %8, %9 : vector<32x20xf32>
    %11 = tpu.reciprocal %10 {approx = true} : vector<32x20xf32> -> vector<32x20xf32>
    %12 = arith.mulf %8, %11 : vector<32x20xf32>
    %c0_6 = arith.constant 0 : index
    %c0_7 = arith.constant 0 : index
    %13 = vector.load %arg3[%c0_6, %c0_7] : memref<1x20xf32, #tpu.memory_space<vmem>>, vector<1x20xf32>
    %cst_8 = arith.constant 5.000000e-01 : f32
    %14 = vector.broadcast %cst_8 : f32 to vector<1x20xf32>
    %15 = arith.cmpf ogt, %13, %14 : vector<1x20xf32>
    %cst_9 = arith.constant 1.000000e+00 : f32
    %16 = vector.shape_cast %15 : vector<1x20xi1> to vector<1x20xi1>
    %17 = vector.broadcast %16 : vector<1x20xi1> to vector<32x20xi1>
    %18 = vector.broadcast %cst_9 : f32 to vector<32x20xf32>
    %19 = arith.select %17, %12, %18 : vector<32x20xi1>, vector<32x20xf32>
    %20 = arith.mulf %2, %19 : vector<32x20xf32>
    %c0_10 = arith.constant 0 : index
    %c0_11 = arith.constant 0 : index
    %21 = vector.load %arg4[%c0_10, %c0_11] : memref<20x26xf32, #tpu.memory_space<vmem>>, vector<20x26xf32>
    %cst_12 = arith.constant dense<0.000000e+00> : vector<32x26xf32>
    %22 = tpu.matmul %20, %21, %cst_12 {dimension_numbers = #tpu.dot_dimension_numbers<[1], [0], [0], [1], [0, 0, 1, 1], [], []>} : vector<32x20xf32>, vector<20x26xf32>, vector<32x26xf32> -> vector<32x26xf32>
    %c0_13 = arith.constant 0 : index
    %c0_14 = arith.constant 0 : index
    %23 = vector.load %arg5[%c0_13, %c0_14] : memref<1x26xf32, #tpu.memory_space<vmem>>, vector<1x26xf32>
    %24 = vector.broadcast %23 : vector<1x26xf32> to vector<32x26xf32>
    %25 = arith.addf %22, %24 : vector<32x26xf32>
    %26 = tpu.iota {dimensions = array<i32: 1>} : vector<32x26xi32>
    %c8_i32 = arith.constant 8 : i32
    %27 = vector.broadcast %c8_i32 : i32 to vector<32x26xi32>
    %28 = arith.cmpi slt, %26, %27 : vector<32x26xi32>
    %cst_15 = arith.constant 0.000000e+00 : f32
    %29 = vector.broadcast %cst_15 : f32 to vector<32x26xf32>
    %30 = arith.maximumf %25, %29 : vector<32x26xf32>
    %31 = arith.select %28, %30, %25 : vector<32x26xi1>, vector<32x26xf32>
    %c0_16 = arith.constant 0 : index
    %c0_17 = arith.constant 0 : index
    %32 = vector.load %arg6[%c0_16, %c0_17] : memref<32x26xf32, #tpu.memory_space<vmem>>, vector<32x26xf32>
    tpu.vector_store %arg6[%c0_16, %c0_17], %31 {strides = array<i32>} : memref<32x26xf32, #tpu.memory_space<vmem>>, vector<32x26xf32>,
    return
  }
  func.func @transform_0(%arg0: i32) -> (i32, i32) {
    %c0_i32 = arith.constant 0 : i32
    %c0_i32_0 = arith.constant 0 : i32
    return %arg0, %c0_i32 : i32, i32
  }
  func.func @transform_1(%arg0: i32) -> (i32, i32) {
    %c0_i32 = arith.constant 0 : i32
    %c0_i32_0 = arith.constant 0 : i32
    %c0_i32_1 = arith.constant 0 : i32
    return %c0_i32, %c0_i32_0 : i32, i32
  }
  func.func @transform_2(%arg0: i32) -> (i32, i32) {
    %c0_i32 = arith.constant 0 : i32
    %c0_i32_0 = arith.constant 0 : i32
    %c0_i32_1 = arith.constant 0 : i32
    return %c0_i32, %c0_i32_0 : i32, i32
  }
  func.func @transform_3(%arg0: i32) -> (i32, i32) {
    %c0_i32 = arith.constant 0 : i32
    %c0_i32_0 = arith.constant 0 : i32
    %c0_i32_1 = arith.constant 0 : i32
    return %c0_i32, %c0_i32_0 : i32, i32
  }
  func.func @transform_4(%arg0: i32) -> (i32, i32) {
    %c0_i32 = arith.constant 0 : i32
    %c0_i32_0 = arith.constant 0 : i32
    %c0_i32_1 = arith.constant 0 : i32
    return %c0_i32, %c0_i32_0 : i32, i32
  }
  func.func @transform_5(%arg0: i32) -> (i32, i32) {
    %c0_i32 = arith.constant 0 : i32
    %c0_i32_0 = arith.constant 0 : i32
    return %arg0, %c0_i32 : i32, i32
  }
}

module attributes {stable_mosaic.version = 11 : i64} {
  func.func @kernel(%arg0: i32, %arg1: memref<16x26xf32, #tpu.memory_space<vmem>>, %arg2: memref<16x8xf32, #tpu.memory_space<vmem>>, %arg3: memref<26x32xf32, #tpu.memory_space<vmem>>, %arg4: memref<8x32xf32, #tpu.memory_space<vmem>>, %arg5: memref<1x32xf32, #tpu.memory_space<vmem>>, %arg6: memref<32x3xf32, #tpu.memory_space<vmem>>, %arg7: memref<1x3xf32, #tpu.memory_space<vmem>>, %arg8: memref<26x9xf32, #tpu.memory_space<vmem>>, %arg9: memref<9x9xf32, #tpu.memory_space<vmem>>, %arg10: memref<16x12xf32, #tpu.memory_space<vmem>>) attributes {dimension_semantics = [#tpu.dimension_semantics<parallel>], iteration_bounds = array<i64: 1>, scalar_prefetch = 0 : i64, scratch_operands = 0 : i64, tpu.core_type = #tpu.core_type<tc>, window_params = [{transform_indices = @transform_0, window_bounds = array<i64: 16, 26>}, {transform_indices = @transform_1, window_bounds = array<i64: 16, 8>}, {pipeline_mode = #tpu.pipeline_mode<synchronous>, transform_indices = @transform_2, window_bounds = array<i64: 26, 32>}, {pipeline_mode = #tpu.pipeline_mode<synchronous>, transform_indices = @transform_3, window_bounds = array<i64: 8, 32>}, {pipeline_mode = #tpu.pipeline_mode<synchronous>, transform_indices = @transform_4, window_bounds = array<i64: 1, 32>}, {pipeline_mode = #tpu.pipeline_mode<synchronous>, transform_indices = @transform_5, window_bounds = array<i64: 32, 3>}, {pipeline_mode = #tpu.pipeline_mode<synchronous>, transform_indices = @transform_6, window_bounds = array<i64: 1, 3>}, {pipeline_mode = #tpu.pipeline_mode<synchronous>, transform_indices = @transform_7, window_bounds = array<i64: 26, 9>}, {pipeline_mode = #tpu.pipeline_mode<synchronous>, transform_indices = @transform_8, window_bounds = array<i64: 9, 9>}, {transform_indices = @transform_9, window_bounds = array<i64: 16, 12>}]} {
    %c0 = arith.constant 0 : index
    %c0_0 = arith.constant 0 : index
    %0 = vector.load %arg1[%c0, %c0_0] : memref<16x26xf32, #tpu.memory_space<vmem>>, vector<16x26xf32>
    %c0_1 = arith.constant 0 : index
    %c0_2 = arith.constant 0 : index
    %1 = vector.load %arg2[%c0_1, %c0_2] : memref<16x8xf32, #tpu.memory_space<vmem>>, vector<16x8xf32>
    %c0_3 = arith.constant 0 : index
    %c0_4 = arith.constant 0 : index
    %2 = vector.load %arg3[%c0_3, %c0_4] : memref<26x32xf32, #tpu.memory_space<vmem>>, vector<26x32xf32>
    %cst = arith.constant dense<0.000000e+00> : vector<16x32xf32>
    %3 = tpu.matmul %0, %2, %cst {dimension_numbers = #tpu.dot_dimension_numbers<[1], [0], [0], [1], [0, 0, 1, 1], [], []>} : vector<16x26xf32>, vector<26x32xf32>, vector<16x32xf32> -> vector<16x32xf32>
    %c0_5 = arith.constant 0 : index
    %c0_6 = arith.constant 0 : index
    %4 = vector.load %arg4[%c0_5, %c0_6] : memref<8x32xf32, #tpu.memory_space<vmem>>, vector<8x32xf32>
    %cst_7 = arith.constant dense<0.000000e+00> : vector<16x32xf32>
    %5 = tpu.matmul %1, %4, %cst_7 {dimension_numbers = #tpu.dot_dimension_numbers<[1], [0], [0], [1], [0, 0, 1, 1], [], []>} : vector<16x8xf32>, vector<8x32xf32>, vector<16x32xf32> -> vector<16x32xf32>
    %6 = arith.addf %3, %5 : vector<16x32xf32>
    %c0_8 = arith.constant 0 : index
    %c0_9 = arith.constant 0 : index
    %7 = vector.load %arg5[%c0_8, %c0_9] : memref<1x32xf32, #tpu.memory_space<vmem>>, vector<1x32xf32>
    %8 = vector.broadcast %7 : vector<1x32xf32> to vector<16x32xf32>
    %9 = arith.addf %6, %8 : vector<16x32xf32>
    %c0_10 = arith.constant 0 : index
    %c0_11 = arith.constant 0 : index
    %10 = vector.load %arg6[%c0_10, %c0_11] : memref<32x3xf32, #tpu.memory_space<vmem>>, vector<32x3xf32>
    %cst_12 = arith.constant dense<0.000000e+00> : vector<16x3xf32>
    %11 = tpu.matmul %9, %10, %cst_12 {dimension_numbers = #tpu.dot_dimension_numbers<[1], [0], [0], [1], [0, 0, 1, 1], [], []>} : vector<16x32xf32>, vector<32x3xf32>, vector<16x3xf32> -> vector<16x3xf32>
    %c0_13 = arith.constant 0 : index
    %c0_14 = arith.constant 0 : index
    %12 = vector.load %arg7[%c0_13, %c0_14] : memref<1x3xf32, #tpu.memory_space<vmem>>, vector<1x3xf32>
    %13 = vector.broadcast %12 : vector<1x3xf32> to vector<16x3xf32>
    %14 = arith.addf %11, %13 : vector<16x3xf32>
    %c0_15 = arith.constant 0 : index
    %c0_16 = arith.constant 0 : index
    %15 = vector.load %arg8[%c0_15, %c0_16] : memref<26x9xf32, #tpu.memory_space<vmem>>, vector<26x9xf32>
    %cst_17 = arith.constant dense<0.000000e+00> : vector<16x9xf32>
    %16 = tpu.matmul %0, %15, %cst_17 {dimension_numbers = #tpu.dot_dimension_numbers<[1], [0], [0], [1], [0, 0, 1, 1], [], []>} : vector<16x26xf32>, vector<26x9xf32>, vector<16x9xf32> -> vector<16x9xf32>
    %17 = arith.mulf %16, %16 : vector<16x9xf32>
    %c0_18 = arith.constant 0 : index
    %c0_19 = arith.constant 0 : index
    %18 = vector.load %arg9[%c0_18, %c0_19] : memref<9x9xf32, #tpu.memory_space<vmem>>, vector<9x9xf32>
    %cst_20 = arith.constant dense<0.000000e+00> : vector<16x9xf32>
    %19 = tpu.matmul %17, %18, %cst_20 {dimension_numbers = #tpu.dot_dimension_numbers<[1], [0], [0], [1], [0, 0, 1, 1], [], []>} : vector<16x9xf32>, vector<9x9xf32>, vector<16x9xf32> -> vector<16x9xf32>
    %cst_21 = arith.constant 9.99999996E-13 : f32
    %20 = vector.broadcast %cst_21 : f32 to vector<16x9xf32>
    %21 = arith.addf %19, %20 : vector<16x9xf32>
    %22 = math.rsqrt %21 : vector<16x9xf32>
    %23 = arith.mulf %16, %22 : vector<16x9xf32>
    %24 = tpu.concatenate %14, %23 in 1 : vector<16x3xf32>, vector<16x9xf32> -> vector<16x12xf32>
    %c0_22 = arith.constant 0 : index
    %c0_23 = arith.constant 0 : index
    %25 = vector.load %arg10[%c0_22, %c0_23] : memref<16x12xf32, #tpu.memory_space<vmem>>, vector<16x12xf32>
    tpu.vector_store %arg10[%c0_22, %c0_23], %24 {strides = array<i32>} : memref<16x12xf32, #tpu.memory_space<vmem>>, vector<16x12xf32>,
    return
  }
  func.func @transform_0(%arg0: i32) -> (i32, i32) {
    %c0_i32 = arith.constant 0 : i32
    %c0_i32_0 = arith.constant 0 : i32
    return %arg0, %c0_i32 : i32, i32
  }
  func.func @transform_1(%arg0: i32) -> (i32, i32) {
    %c0_i32 = arith.constant 0 : i32
    %c0_i32_0 = arith.constant 0 : i32
    return %arg0, %c0_i32 : i32, i32
  }
  func.func @transform_2(%arg0: i32) -> (i32, i32) {
    %c0_i32 = arith.constant 0 : i32
    %c0_i32_0 = arith.constant 0 : i32
    %c0_i32_1 = arith.constant 0 : i32
    return %c0_i32, %c0_i32_0 : i32, i32
  }
  func.func @transform_3(%arg0: i32) -> (i32, i32) {
    %c0_i32 = arith.constant 0 : i32
    %c0_i32_0 = arith.constant 0 : i32
    %c0_i32_1 = arith.constant 0 : i32
    return %c0_i32, %c0_i32_0 : i32, i32
  }
  func.func @transform_4(%arg0: i32) -> (i32, i32) {
    %c0_i32 = arith.constant 0 : i32
    %c0_i32_0 = arith.constant 0 : i32
    %c0_i32_1 = arith.constant 0 : i32
    return %c0_i32, %c0_i32_0 : i32, i32
  }
  func.func @transform_5(%arg0: i32) -> (i32, i32) {
    %c0_i32 = arith.constant 0 : i32
    %c0_i32_0 = arith.constant 0 : i32
    %c0_i32_1 = arith.constant 0 : i32
    return %c0_i32, %c0_i32_0 : i32, i32
  }
  func.func @transform_6(%arg0: i32) -> (i32, i32) {
    %c0_i32 = arith.constant 0 : i32
    %c0_i32_0 = arith.constant 0 : i32
    %c0_i32_1 = arith.constant 0 : i32
    return %c0_i32, %c0_i32_0 : i32, i32
  }
  func.func @transform_7(%arg0: i32) -> (i32, i32) {
    %c0_i32 = arith.constant 0 : i32
    %c0_i32_0 = arith.constant 0 : i32
    %c0_i32_1 = arith.constant 0 : i32
    return %c0_i32, %c0_i32_0 : i32, i32
  }
  func.func @transform_8(%arg0: i32) -> (i32, i32) {
    %c0_i32 = arith.constant 0 : i32
    %c0_i32_0 = arith.constant 0 : i32
    %c0_i32_1 = arith.constant 0 : i32
    return %c0_i32, %c0_i32_0 : i32, i32
  }
  func.func @transform_9(%arg0: i32) -> (i32, i32) {
    %c0_i32 = arith.constant 0 : i32
    %c0_i32_0 = arith.constant 0 : i32
    return %arg0, %c0_i32 : i32, i32
  }
}

</mosaic_0001>

<bundles_post_ra>
// kernel: _lambda_.3
= control target key start
LH: loop header
LB: loop body
LE: loop exit
PB: predicated region body
PF: predicated region fallthrough
CT: control target
= control target key end

     0   :  { %vm46_vm0 = vcmask 130048   ;;  %v259_v37 = vlaneseq  ;;  %v560_v52 = vmov 0   ;;  %s782_s1 = inlined_call_operand.vmem [shape: f32[16,16], index: 1, kind: input, shape index: {}]   ;;  %s783_s0 = inlined_call_operand.vmem [shape: f32[64,16], index: 0, kind: input, shape index: {}]   ;;  %s784_s3 = inlined_call_operand.vmem [shape: f32[16,20], index: 3, kind: input, shape index: {}]   ;;  %s785_s2 = inlined_call_operand.vmem [shape: f32[1,16], index: 2, kind: input, shape index: {}]   ;;  %s786_s4 = inlined_call_operand.vmem [shape: f32[1,20], index: 4, kind: input, shape index: {}]   ;;  %s787_s5 = inlined_call_operand.vmem [shape: f32[64,20], index: 5, kind: output, shape index: {}]  }
   0x1   :  { %v44_v0 = vld [vmem:[%s782_s1] sm:$0xff]  ;;  %v45_v1 = vld [vmem:[%s782_s1 + $0x8] sm:$0xff]  ;;  %v22_v6 = vld [vmem:[%s783_s0 + $0x10] sm:$0xff] }
   0x2   :  { %v20_v2 = vld [vmem:[%s783_s0] sm:$0xff]  ;;  %v519_v3 = vpack.c.bf16 %v45_v1, %v44_v0  ;;  %v21_v5 = vld [vmem:[%s783_s0 + $0x8] sm:$0xff]  ;;  %v23_v7 = vld [vmem:[%s783_s0 + $0x18] sm:$0xff]  ;;  %v613_v9 = vmul.f32 0.999995, %v22_v6  ;;  %v260_v43 = vshrl.u32 %v259_v37, 7 }
   0x3   :  { %v600_v4 = vmul.f32 0.999995, %v20_v2  ;;  %v611_v8 = vmul.f32 0.999995, %v21_v5  ;;  %v617_v11 = vmul.f32 0.999995, %v23_v7 }
   0x4   :  { %520 = vmatprep.subr.bf16.mxu0 %v519_v3  ;;  %v24_v12 = vld [vmem:[%s783_s0 + $0x20] sm:$0xff]  ;;  %v38_v14 = vmul.f32 %v613_v9, %v613_v9  ;;  %v25_v16 = vld [vmem:[%s783_s0 + $0x28] sm:$0xff]  ;;  %v26_v17 = vld [vmem:[%s783_s0 + $0x30] sm:$0xff]  ;;  %v261_v49 = vsub.s32 0, %v260_v43 }
   0x5   :  { %v36_v10 = vmul.f32 %v600_v4, %v600_v4  ;;  %522 = vmatpush3.bf16.msra.mxu0 %v519_v3  ;;  %v37_v13 = vmul.f32 %v611_v8, %v611_v8  ;;  %v626_v15 = vmul.f32 0.999995, %v24_v12  ;;  %v39_v18 = vmul.f32 %v617_v11, %v617_v11  ;;  %v27_v22 = vld [vmem:[%s783_s0 + $0x38] sm:$0xff]  ;;  %v280_v27 = vld [vmem:[%s784_s3] sm:$0xff]  ;;  %v281_v28 = vld [vmem:[%s784_s3 + $0x8] sm:$0xff] }
   0x6   :  { %v638_v19 = vmul.f32 0.999995, %v25_v16  ;;  %v643_v21 = vmul.f32 0.999995, %v26_v17  ;;  %v651_v24 = vmul.f32 0.999995, %v27_v22  ;;  %v523_v29 = vpack.c.bf16 %v281_v28, %v280_v27 }
   0x7   :  { %491 = vmatprep.mubr.msk.f32.mxu0 %vm46_vm0, %v36_v10  ;;  %v40_v20 = vmul.f32 %v626_v15, %v626_v15  ;;  %v256_v40 = vld [vmem:[%s785_s2] sm:$0x1] }
   0x8   :  { %492 = vmatmul.mubr.msk.f32.vlgmr.msra.gmra.mrb[0].mxu0 %vm46_vm0, %v37_v13  ;;  %v41_v23 = vmul.f32 %v638_v19, %v638_v19  ;;  %v42_v25 = vmul.f32 %v643_v21, %v643_v21  ;;  %v43_v26 = vmul.f32 %v651_v24, %v651_v24  ;;  %524 = vmatprep.subr.bf16.mxu1 %v523_v29  ;;  %vm257_vm1 = vcmp.gt.f32.partialorder %v256_v40, 0.5 }
   0x9   :  { %494 = vmatprep.mubr.msk.f32.mxu0 %vm46_vm0, %v38_v14  ;;  %526 = vmatpush3.bf16.msra.mxu1 %v523_v29  ;;  %v258_v53 = vsel %vm257_vm1, 1, %v560_v52 }
   0xa   :  { %v683_v61 = vrot.slane %v258_v53, %v261_v49 }
   0xc   :  { %495 = vmatmul.mubr.msk.f32.gmra.mrb[2].mxu0 %vm46_vm0, %v39_v18 }
   0xd   :  { %497 = vmatprep.mubr.msk.f32.mxu0 %vm46_vm0, %v40_v20 }
  0x10   :  { %498 = vmatmul.mubr.msk.f32.gmra.mrb[4].mxu0 %vm46_vm0, %v41_v23 }
  0x11   :  { %500 = vmatprep.mubr.msk.f32.mxu0 %vm46_vm0, %v42_v25 }
  0x14   :  { %501 = vmatmul.mubr.msk.f32.gmra.mrb[6].mxu0 %vm46_vm0, %v43_v26 }
  0xdb   :  { %v493_v30 = vpop.f32.mrb[0].mxu0 }
  0xdc   :  { %v143_v31 = vadd.f32 0.001, %v493_v30  ;;  %v137_v32 = vpop.f32.mrb[1].mxu0 }
  0xdd   :  { %v138_v33 = vadd.f32 0.001, %v137_v32 }
  0xde   :  { %528 = vrsqrt.f32 %v143_v31  ;;  %vm185_vm2 = vcmp.eq.f32.partialorder %v143_v31, inf  ;;  %vm187_vm3 = vcmp.eq.f32.partialorder %v143_v31, 0.0  ;;  %v188_v56 = vand.u32 2147483648, %v143_v31 }
  0xdf   :  { %530 = vrsqrt.f32 %v138_v33  ;;  %v496_v34 = vpop.f32.mrb[2].mxu0  ;;  %vm178_vm4 = vcmp.eq.f32.partialorder %v138_v33, inf  ;;  %v181_v57 = vand.u32 2147483648, %v138_v33  ;;  %vm180_vm5 = vcmp.eq.f32.partialorder %v138_v33, 0.0 }
  0xe0   :  { %v153_v35 = vadd.f32 0.001, %v496_v34  ;;  %v147_v36 = vpop.f32.mrb[3].mxu0 }
  0xe1   :  { %v148_v38 = vadd.f32 0.001, %v147_v36 }
  0xe2   :  { %532 = vrsqrt.f32 %v153_v35  ;;  %vm199_vm6 = vcmp.eq.f32.partialorder %v153_v35, inf  ;;  %vm201_vm7 = vcmp.eq.f32.partialorder %v153_v35, 0.0  ;;  %v202_v6 = vand.u32 2147483648, %v153_v35 }
  0xe3   :  { %534 = vrsqrt.f32 %v148_v38  ;;  %v499_v39 = vpop.f32.mrb[4].mxu0  ;;  %vm192_vm8 = vcmp.eq.f32.partialorder %v148_v38, inf  ;;  %v195_v7 = vand.u32 2147483648, %v148_v38  ;;  %vm194_vm9 = vcmp.eq.f32.partialorder %v148_v38, 0.0 }
  0xe4   :  { %v670_v41 = vadd.f32 0.001, %v499_v39  ;;  %v157_v42 = vpop.f32.mrb[5].mxu0 }
  0xe5   :  { %v673_v44 = vadd.f32 0.001, %v157_v42 }
  0xe6   :  { %536 = vrsqrt.f32 %v670_v41  ;;  %vm213_vm10 = vcmp.eq.f32.partialorder %v670_v41, inf  ;;  %vm215_vm11 = vcmp.eq.f32.partialorder %v670_v41, 0.0  ;;  %v216_v25 = vand.u32 2147483648, %v670_v41 }
  0xe7   :  { %538 = vrsqrt.f32 %v673_v44  ;;  %v502_v45 = vpop.f32.mrb[6].mxu0  ;;  %vm206_vm12 = vcmp.eq.f32.partialorder %v673_v44, inf  ;;  %v209_v26 = vand.u32 2147483648, %v673_v44  ;;  %vm208_vm13 = vcmp.eq.f32.partialorder %v673_v44, 0.0 }
  0xe8   :  { %v529_v46 = vpop.eup %528  ;;  %v677_v47 = vadd.f32 0.001, %v502_v45  ;;  %v167_v48 = vpop.f32.mrb[7].mxu0 }
  0xe9   :  { %v531_v50 = vpop.eup %530  ;;  %v679_v51 = vadd.f32 0.001, %v167_v48  ;;  %v184_v54 = vmul.f32 %v529_v46, %v143_v31 }
  0xea   :  { %540 = vrsqrt.f32 %v677_v47  ;;  %v177_v55 = vmul.f32 %v531_v50, %v138_v33  ;;  %vm227_vm14 = vcmp.eq.f32.partialorder %v677_v47, inf  ;;  %vm229_vm15 = vcmp.eq.f32.partialorder %v677_v47, 0.0 }
  0xeb   :  { %542 = vrsqrt.f32 %v679_v51  ;;  %v186_v58 = vsel %vm185_vm2, %v143_v31, %v184_v54  ;;  %vm220_vm1 = vcmp.eq.f32.partialorder %v679_v51, inf  ;;  %v223_v39 = vand.u32 2147483648, %v679_v51 }
  0xec   :  { %v533_v59 = vpop.eup %532  ;;  %v179_v60 = vsel %vm178_vm4, %v138_v33, %v177_v55  ;;  %v189_v62 = vsel %vm187_vm3, %v188_v56, %v186_v58  ;;  %vm222_vm2 = vcmp.eq.f32.partialorder %v679_v51, 0.0  ;;  %vm263_vm3 = vcmp.eq.s32.totalorder %v683_v61, 1 }
  0xed   :  { %v535_v63 = vpop.eup %534  ;;  %v182_v0 = vsel %vm180_vm5, %v181_v57, %v179_v60  ;;  %v233_v1 = vadd.f32 0.001, %v189_v62  ;;  %v198_v2 = vmul.f32 %v533_v59, %v153_v35  ;;  %vm437_vm5 = vcmask 162816  }
  0xee   :  { %v232_v3 = vadd.f32 0.001, %v182_v0  ;;  %v191_v5 = vmul.f32 %v535_v63, %v148_v38 }
  0xef   :  { %544 = vrcp.f32 %v233_v1  ;;  %v200_v10 = vsel %vm199_vm6, %v153_v35, %v198_v2 }
  0xf0   :  { %v537_v12 = vpop.eup %536  ;;  %546 = vrcp.f32 %v232_v3  ;;  %v193_v13 = vsel %vm192_vm8, %v148_v38, %v191_v5  ;;  %v203_v14 = vsel %vm201_vm7, %v202_v6, %v200_v10  ;;  %v230_v38 = vand.u32 2147483648, %v677_v47 }
  0xf1   :  { %v539_v16 = vpop.eup %538  ;;  %v196_v17 = vsel %vm194_vm9, %v195_v7, %v193_v13  ;;  %v235_v18 = vadd.f32 0.001, %v203_v14  ;;  %v212_v20 = vmul.f32 %v537_v12, %v670_v41 }
  0xf2   :  { %v234_v22 = vadd.f32 0.001, %v196_v17  ;;  %v205_v23 = vmul.f32 %v539_v16, %v673_v44 }
  0xf3   :  { %548 = vrcp.f32 %v235_v18  ;;  %v214_v27 = vsel %vm213_vm10, %v670_v41, %v212_v20 }
  0xf4   :  { %v541_v28 = vpop.eup %540  ;;  %550 = vrcp.f32 %v234_v22  ;;  %v207_v29 = vsel %vm206_vm12, %v673_v44, %v205_v23  ;;  %v217_v30 = vsel %vm215_vm11, %v216_v25, %v214_v27 }
  0xf5   :  { %v543_v31 = vpop.eup %542  ;;  %v210_v32 = vsel %vm208_vm13, %v209_v26, %v207_v29  ;;  %v237_v33 = vadd.f32 0.001, %v217_v30  ;;  %v226_v34 = vmul.f32 %v541_v28, %v677_v47 }
  0xf6   :  { %v219_v35 = vmul.f32 %v543_v31, %v679_v51  ;;  %v236_v36 = vadd.f32 0.001, %v210_v32 }
  0xf7   :  { %552 = vrcp.f32 %v237_v33  ;;  %v228_v40 = vsel %vm227_vm14, %v677_v47, %v226_v34 }
  0xf8   :  { %554 = vrcp.f32 %v236_v36  ;;  %v221_v41 = vsel %vm220_vm1, %v679_v51, %v219_v35  ;;  %v231_v42 = vsel %vm229_vm15, %v230_v38, %v228_v40 }
  0xf9   :  { %v545_v43 = vpop.eup %544  ;;  %v224_v44 = vsel %vm222_vm2, %v223_v39, %v221_v41  ;;  %v239_v45 = vadd.f32 0.001, %v231_v42 }
  0xfa   :  { %v547_v46 = vpop.eup %546  ;;  %v249_v48 = vmul.f32 %v545_v43, %v189_v62  ;;  %v238_v49 = vadd.f32 0.001, %v224_v44 }
  0xfb   :  { %v248_v50 = vmul.f32 %v547_v46, %v182_v0  ;;  %556 = vrcp.f32 %v239_v45 }
  0xfc   :  { %v265_v52 = vsel %vm263_vm3, %v249_v48, 1.0  ;;  %558 = vrcp.f32 %v238_v49 }
  0xfd   :  { %v549_v47 = vpop.eup %548  ;;  %v264_v53 = vsel %vm263_vm3, %v248_v50, 1.0  ;;  %v273_v56 = vmul.f32 %v265_v52, %v611_v8 }
  0xfe   :  { %v551_v51 = vpop.eup %550  ;;  %v272_v54 = vmul.f32 %v264_v53, %v600_v4  ;;  %v251_v55 = vmul.f32 %v549_v47, %v203_v14 }
  0xff   :  { %v250_v57 = vmul.f32 %v551_v51, %v196_v17 }
 0x100   :  { %507 = vmatprep.mubr.msk.f32.mxu1 %vm46_vm0, %v272_v54  ;;  %v267_v58 = vsel %vm263_vm3, %v251_v55, 1.0 }
 0x101   :  { %v553_v59 = vpop.eup %552  ;;  %508 = vmatmul.mubr.msk.f32.vlgmr.msra.gmra.mrb[0].mxu1 %vm46_vm0, %v273_v56  ;;  %v266_v60 = vsel %vm263_vm3, %v250_v57, 1.0  ;;  %v275_v4 = vmul.f32 %v267_v58, %v617_v11 }
 0x102   :  { %v555_v62 = vpop.eup %554  ;;  %v274_v63 = vmul.f32 %v266_v60, %v613_v9  ;;  %v253_v0 = vmul.f32 %v553_v59, %v217_v30 }
 0x103   :  { %v252_v1 = vmul.f32 %v555_v62, %v210_v32 }
 0x104   :  { %510 = vmatprep.mubr.msk.f32.mxu1 %vm46_vm0, %v274_v63  ;;  %v269_v8 = vsel %vm263_vm3, %v253_v0, 1.0 }
 0x105   :  { %v557_v2 = vpop.eup %556  ;;  %511 = vmatmul.mubr.msk.f32.gmra.mrb[2].mxu1 %vm46_vm0, %v275_v4  ;;  %v268_v3 = vsel %vm263_vm3, %v252_v1, 1.0  ;;  %v277_v9 = vmul.f32 %v269_v8, %v638_v19  ;;  %v419_v19 = vand.u32 127, %v259_v37 }
 0x106   :  { %v559_v5 = vpop.eup %558  ;;  %v276_v6 = vmul.f32 %v268_v3, %v626_v15  ;;  %v255_v7 = vmul.f32 %v557_v2, %v231_v42  ;;  %v458_v15 = vld [vmem:[%s786_s4] ss:$0 sm:$0xff] }
 0x107   :  { %v254_v10 = vmul.f32 %v559_v5, %v224_v44  ;;  %vm420_vm4 = vcmp.lt.s32.totalorder %v419_v19, 8 }
 0x108   :  { %513 = vmatprep.mubr.msk.f32.mxu1 %vm46_vm0, %v276_v6  ;;  %v271_v11 = vsel %vm263_vm3, %v255_v7, 1.0 }
 0x109   :  { %514 = vmatmul.mubr.msk.f32.gmra.mrb[4].mxu1 %vm46_vm0, %v277_v9  ;;  %v270_v12 = vsel %vm263_vm3, %v254_v10, 1.0  ;;  %v279_v14 = vmul.f32 %v271_v11, %v651_v24 }
 0x10a   :  { %v278_v13 = vmul.f32 %v270_v12, %v643_v21 }
 0x10c   :  { %516 = vmatprep.mubr.msk.f32.mxu1 %vm46_vm0, %v278_v13 }
 0x10d   :  { %517 = vmatmul.mubr.msk.f32.gmra.mrb[6].mxu1 %vm46_vm0, %v279_v14 }
 0x1d4   :  { %v509_v16 = vpop.f32.mrb[0].mxu1 }
 0x1d5   :  { %v385_v17 = vadd.f32 %v509_v16, %v458_v15  ;;  %v379_v18 = vpop.f32.mrb[1].mxu1 }
 0x1d6   :  { %v380_v61 = vadd.f32 %v458_v15, %v379_v18 }
 0x1d7   :  { %v422_v20 = vmax.f32 %v385_v17, 0.0 }
 0x1d8   :  { %v421_v21 = vmax.f32 %v380_v61, 0.0  ;;  %v512_v22 = vpop.f32.mrb[2].mxu1 }
 0x1d9   :  { %v430_v24 = vsel %vm420_vm4, %v422_v20, %v385_v17  ;;  %v395_v23 = vadd.f32 %v512_v22, %v458_v15  ;;  %v389_v25 = vpop.f32.mrb[3].mxu1 }
 0x1da   :  { %439 = vst.msk [vmem:[%s787_s5 + $0x8] sm:$0xff] %vm437_vm5, %v430_v24  ;;  %v429_v37 = vsel %vm420_vm4, %v421_v21, %v380_v61  ;;  %v390_v26 = vadd.f32 %v458_v15, %v389_v25 }
 0x1db   :  { %438 = vst.msk [vmem:[%s787_s5] sm:$0xff] %vm437_vm5, %v429_v37  ;;  %v424_v27 = vmax.f32 %v395_v23, 0.0 }
 0x1dc   :  { %v423_v28 = vmax.f32 %v390_v26, 0.0  ;;  %v515_v29 = vpop.f32.mrb[4].mxu1 }
 0x1dd   :  { %v432_v30 = vsel %vm420_vm4, %v424_v27, %v395_v23  ;;  %v405_v31 = vadd.f32 %v515_v29, %v458_v15  ;;  %v399_v32 = vpop.f32.mrb[5].mxu1 }
 0x1de   :  { %441 = vst.msk [vmem:[%s787_s5 + $0x18] sm:$0xff] %vm437_vm5, %v432_v30  ;;  %v431_v33 = vsel %vm420_vm4, %v423_v28, %v390_v26  ;;  %v400_v34 = vadd.f32 %v458_v15, %v399_v32 }
 0x1df   :  { %440 = vst.msk [vmem:[%s787_s5 + $0x10] sm:$0xff] %vm437_vm5, %v431_v33  ;;  %v426_v35 = vmax.f32 %v405_v31, 0.0 }
 0x1e0   :  { %v425_v36 = vmax.f32 %v400_v34, 0.0  ;;  %v518_v38 = vpop.f32.mrb[6].mxu1 }
 0x1e1   :  { %v434_v39 = vsel %vm420_vm4, %v426_v35, %v405_v31  ;;  %v415_v40 = vadd.f32 %v518_v38, %v458_v15  ;;  %v409_v41 = vpop.f32.mrb[7].mxu1 }
 0x1e2   :  { %443 = vst.msk [vmem:[%s787_s5 + $0x28] sm:$0xff] %vm437_vm5, %v434_v39  ;;  %v433_v42 = vsel %vm420_vm4, %v425_v36, %v400_v34  ;;  %v410_v43 = vadd.f32 %v458_v15, %v409_v41 }
 0x1e3   :  { %442 = vst.msk [vmem:[%s787_s5 + $0x20] sm:$0xff] %vm437_vm5, %v433_v42  ;;  %v428_v44 = vmax.f32 %v415_v40, 0.0 }
 0x1e4   :  { %v427_v45 = vmax.f32 %v410_v43, 0.0 }
 0x1e5   :  { %v436_v46 = vsel %vm420_vm4, %v428_v44, %v415_v40 }
 0x1e6   :  { %445 = vst.msk [vmem:[%s787_s5 + $0x38] sm:$0xff] %vm437_vm5, %v436_v46  ;;  %v435_v48 = vsel %vm420_vm4, %v427_v45, %v410_v43 }
 0x1e7   :  { %444 = vst.msk [vmem:[%s787_s5 + $0x30] sm:$0xff] %vm437_vm5, %v435_v48 }

// kernel: _lambda_.4
= control target key start
LH: loop header
LB: loop body
LE: loop exit
PB: predicated region body
PF: predicated region fallthrough
CT: control target
= control target key end

     0   :  { %vm48_vm0 = vcmask 1043456   ;;  %vm35_vm1 = vcmask 162816   ;;  %v180_v28 = vlaneseq  ;;  %v397_v55 = vmov 0   ;;  %s515_s1 = inlined_call_operand.vmem [shape: f32[20,20], index: 1, kind: input, shape index: {}]   ;;  %s516_s0 = inlined_call_operand.vmem [shape: f32[32,20], index: 0, kind: input, shape index: {}]   ;;  %s517_s3 = inlined_call_operand.vmem [shape: f32[20,26], index: 3, kind: input, shape index: {}]   ;;  %s518_s2 = inlined_call_operand.vmem [shape: f32[1,20], index: 2, kind: input, shape index: {}]   ;;  %s519_s4 = inlined_call_operand.vmem [shape: f32[1,26], index: 4, kind: input, shape index: {}]   ;;  %s520_s5 = inlined_call_operand.vmem [shape: f32[32,26], index: 5, kind: output, shape index: {}]  }
   0x1   :  { %v32_v0 = vld [vmem:[%s515_s1] sm:$0xff]  ;;  %v33_v1 = vld [vmem:[%s515_s1 + $0x8] sm:$0xff]  ;;  %v34_v2 = vld [vmem:[%s515_s1 + $0x10] sm:$0xf]  ;;  %vm314_vm13 = vcmask 211968  }
   0x2   :  { %v372_v3 = vpack.c.bf16 %v33_v1, %v32_v0  ;;  %v20_v4 = vld [vmem:[%s516_s0] sm:$0xff]  ;;  %v21_v5 = vld [vmem:[%s516_s0 + $0x8] sm:$0xff]  ;;  %v22_v6 = vld [vmem:[%s516_s0 + $0x10] sm:$0xff]  ;;  %v181_v32 = vshrl.u32 %v180_v28, 7 }
   0x3   :  { %v446_v7 = vmul.f32 0.999995, %v20_v4  ;;  %v448_v8 = vmul.f32 0.999995, %v21_v5  ;;  %v450_v9 = vmul.f32 0.999995, %v22_v6 }
   0x4   :  { %373 = vmatprep.subr.bf16.mxu0 %v372_v3  ;;  %v23_v10 = vld [vmem:[%s516_s0 + $0x18] sm:$0xff]  ;;  %v193_v16 = vld [vmem:[%s517_s3] sm:$0xff]  ;;  %v194_v17 = vld [vmem:[%s517_s3 + $0x8] sm:$0xff]  ;;  %v182_v52 = vsub.s32 0, %v181_v32 }
   0x5   :  { %375 = vmatpush3.bf16.msra.mxu0 %v372_v3  ;;  %v28_v11 = vmul.f32 %v446_v7, %v446_v7  ;;  %v29_v12 = vmul.f32 %v448_v8, %v448_v8  ;;  %v460_v13 = vmul.f32 0.999995, %v23_v10  ;;  %v30_v14 = vmul.f32 %v450_v9, %v450_v9  ;;  %v195_v19 = vld [vmem:[%s517_s3 + $0x10] sm:$0xf]  ;;  %v177_v29 = vld [vmem:[%s518_s2] sm:$0x1] }
   0x6   :  { %352 = vmatprep.subr.msk.mxu0 %vm48_vm0, %v34_v2  ;;  %v376_v18 = vpack.c.bf16 %v194_v17, %v193_v16  ;;  %vm178_vm2 = vcmp.gt.f32.partialorder %v177_v29, 0.5 }
   0x7   :  { %354 = vmatprep.mubr.msk.f32.mxu0 %vm35_vm1, %v28_v11  ;;  %v31_v15 = vmul.f32 %v460_v13, %v460_v13  ;;  %v179_v56 = vsel %vm178_vm2, 1, %v397_v55 }
   0x8   :  { %377 = vmatprep.subr.bf16.mxu1 %v376_v18  ;;  %v183_v58 = vrot.slane %v179_v56, %v182_v52 }
   0x9   :  { %353 = vmatpush3.msk.msra.mxu0 %vm48_vm0, %v34_v2  ;;  %379 = vmatpush3.bf16.msra.mxu1 %v376_v18 }
   0xa   :  { %355 = vmatmul.mubr.msk.f32.vlgmr.msra.gmra.mrb[0].mxu0 %vm35_vm1, %v29_v12  ;;  %364 = vmatprep.subr.msk.mxu1 %vm48_vm0, %v195_v19  ;;  %vm184_vm11 = vcmp.eq.s32.totalorder %v183_v58, 1 }
   0xb   :  { %357 = vmatprep.mubr.msk.f32.mxu0 %vm35_vm1, %v30_v14 }
   0xd   :  { %365 = vmatpush3.msk.msra.mxu1 %vm48_vm0, %v195_v19 }
   0xe   :  { %358 = vmatmul.mubr.msk.f32.gmra.mrb[2].mxu0 %vm35_vm1, %v31_v15 }
  0xdd   :  { %v356_v20 = vpop.f32.mrb[0].mxu0 }
  0xde   :  { %v124_v21 = vadd.f32 0.001, %v356_v20  ;;  %v118_v22 = vpop.f32.mrb[1].mxu0 }
  0xdf   :  { %v119_v23 = vadd.f32 0.001, %v118_v22 }
  0xe0   :  { %381 = vrsqrt.f32 %v124_v21  ;;  %vm146_vm3 = vcmp.eq.f32.partialorder %v124_v21, inf  ;;  %v149_v35 = vand.u32 2147483648, %v124_v21  ;;  %vm148_vm5 = vcmp.eq.f32.partialorder %v124_v21, 0.0 }
  0xe1   :  { %383 = vrsqrt.f32 %v119_v23  ;;  %v359_v24 = vpop.f32.mrb[2].mxu0  ;;  %vm139_vm4 = vcmp.eq.f32.partialorder %v119_v23, inf  ;;  %v142_v36 = vand.u32 2147483648, %v119_v23  ;;  %vm141_vm6 = vcmp.eq.f32.partialorder %v119_v23, 0.0 }
  0xe2   :  { %v134_v25 = vadd.f32 0.001, %v359_v24  ;;  %v128_v26 = vpop.f32.mrb[3].mxu0 }
  0xe3   :  { %v129_v27 = vadd.f32 0.001, %v128_v26 }
  0xe4   :  { %385 = vrsqrt.f32 %v134_v25  ;;  %vm160_vm7 = vcmp.eq.f32.partialorder %v134_v25, inf  ;;  %vm162_vm8 = vcmp.eq.f32.partialorder %v134_v25, 0.0  ;;  %v163_v47 = vand.u32 2147483648, %v134_v25 }
  0xe5   :  { %387 = vrsqrt.f32 %v129_v27  ;;  %vm153_vm9 = vcmp.eq.f32.partialorder %v129_v27, inf  ;;  %v156_v48 = vand.u32 2147483648, %v129_v27  ;;  %vm155_vm10 = vcmp.eq.f32.partialorder %v129_v27, 0.0 }
  0xea   :  { %v382_v30 = vpop.eup %381 }
  0xeb   :  { %v384_v31 = vpop.eup %383  ;;  %v145_v33 = vmul.f32 %v382_v30, %v124_v21 }
  0xec   :  { %v138_v34 = vmul.f32 %v384_v31, %v119_v23 }
  0xed   :  { %v147_v37 = vsel %vm146_vm3, %v124_v21, %v145_v33 }
  0xee   :  { %v386_v38 = vpop.eup %385  ;;  %v140_v39 = vsel %vm139_vm4, %v119_v23, %v138_v34  ;;  %v150_v40 = vsel %vm148_vm5, %v149_v35, %v147_v37 }
  0xef   :  { %v388_v41 = vpop.eup %387  ;;  %v143_v42 = vsel %vm141_vm6, %v142_v36, %v140_v39  ;;  %v166_v43 = vadd.f32 0.001, %v150_v40  ;;  %v159_v44 = vmul.f32 %v386_v38, %v134_v25 }
  0xf0   :  { %v152_v45 = vmul.f32 %v388_v41, %v129_v27  ;;  %v165_v46 = vadd.f32 0.001, %v143_v42 }
  0xf1   :  { %389 = vrcp.f32 %v166_v43  ;;  %v161_v49 = vsel %vm160_vm7, %v134_v25, %v159_v44 }
  0xf2   :  { %391 = vrcp.f32 %v165_v46  ;;  %v154_v50 = vsel %vm153_vm9, %v129_v27, %v152_v45  ;;  %v164_v51 = vsel %vm162_vm8, %v163_v47, %v161_v49 }
  0xf3   :  { %v157_v53 = vsel %vm155_vm10, %v156_v48, %v154_v50  ;;  %v168_v54 = vadd.f32 0.001, %v164_v51 }
  0xf4   :  { %v167_v57 = vadd.f32 0.001, %v157_v53 }
  0xf5   :  { %393 = vrcp.f32 %v168_v54 }
  0xf6   :  { %395 = vrcp.f32 %v167_v57 }
  0xfb   :  { %v390_v59 = vpop.eup %389 }
  0xfc   :  { %v392_v60 = vpop.eup %391  ;;  %v174_v61 = vmul.f32 %v390_v59, %v150_v40 }
  0xfd   :  { %v173_v62 = vmul.f32 %v392_v60, %v143_v42 }
  0xfe   :  { %v186_v63 = vsel %vm184_vm11, %v174_v61, 1.0 }
  0xff   :  { %v394_v0 = vpop.eup %393  ;;  %v185_v1 = vsel %vm184_vm11, %v173_v62, 1.0  ;;  %v190_v5 = vmul.f32 %v186_v63, %v448_v8  ;;  %v304_v8 = vand.u32 127, %v180_v28 }
 0x100   :  { %v396_v2 = vpop.eup %395  ;;  %v189_v3 = vmul.f32 %v185_v1, %v446_v7  ;;  %v176_v4 = vmul.f32 %v394_v0, %v164_v51  ;;  %v328_v7 = vld [vmem:[%s519_s4] ss:$0 sm:$0xff] }
 0x101   :  { %v175_v6 = vmul.f32 %v396_v2, %v157_v53  ;;  %vm305_vm12 = vcmp.lt.s32.totalorder %v304_v8, 8 }
 0x102   :  { %366 = vmatprep.mubr.msk.f32.mxu1 %vm35_vm1, %v189_v3  ;;  %v188_v10 = vsel %vm184_vm11, %v176_v4, 1.0 }
 0x103   :  { %367 = vmatmul.mubr.msk.f32.vlgmr.msra.gmra.mrb[0].mxu1 %vm35_vm1, %v190_v5  ;;  %v187_v11 = vsel %vm184_vm11, %v175_v6, 1.0  ;;  %v192_v14 = vmul.f32 %v188_v10, %v460_v13 }
 0x104   :  { %v191_v12 = vmul.f32 %v187_v11, %v450_v9 }
 0x106   :  { %369 = vmatprep.mubr.msk.f32.mxu1 %vm35_vm1, %v191_v12 }
 0x107   :  { %370 = vmatmul.mubr.msk.f32.gmra.mrb[2].mxu1 %vm35_vm1, %v192_v14 }
 0x1d6   :  { %v368_v15 = vpop.f32.mrb[0].mxu1 }
 0x1d7   :  { %v290_v16 = vadd.f32 %v368_v15, %v328_v7  ;;  %v284_v17 = vpop.f32.mrb[1].mxu1 }
 0x1d8   :  { %v285_v18 = vadd.f32 %v328_v7, %v284_v17 }
 0x1d9   :  { %v307_v19 = vmax.f32 %v290_v16, 0.0 }
 0x1da   :  { %v306_v9 = vmax.f32 %v285_v18, 0.0  ;;  %v371_v20 = vpop.f32.mrb[2].mxu1 }
 0x1db   :  { %v311_v13 = vsel %vm305_vm12, %v307_v19, %v290_v16  ;;  %v300_v21 = vadd.f32 %v371_v20, %v328_v7  ;;  %v294_v22 = vpop.f32.mrb[3].mxu1 }
 0x1dc   :  { %316 = vst.msk [vmem:[%s520_s5 + $0x8] sm:$0xff] %vm314_vm13, %v311_v13  ;;  %v310_v23 = vsel %vm305_vm12, %v306_v9, %v285_v18  ;;  %v295_v24 = vadd.f32 %v328_v7, %v294_v22 }
 0x1dd   :  { %315 = vst.msk [vmem:[%s520_s5] sm:$0xff] %vm314_vm13, %v310_v23  ;;  %v309_v25 = vmax.f32 %v300_v21, 0.0 }
 0x1de   :  { %v308_v26 = vmax.f32 %v295_v24, 0.0 }
 0x1df   :  { %v313_v27 = vsel %vm305_vm12, %v309_v25, %v300_v21 }
 0x1e0   :  { %318 = vst.msk [vmem:[%s520_s5 + $0x18] sm:$0xff] %vm314_vm13, %v313_v27  ;;  %v312_v28 = vsel %vm305_vm12, %v308_v26, %v295_v24 }
 0x1e1   :  { %317 = vst.msk [vmem:[%s520_s5 + $0x10] sm:$0xff] %vm314_vm13, %v312_v28 }

// kernel: _lambda_.5
= control target key start
LH: loop header
LB: loop body
LE: loop exit
PB: predicated region body
PF: predicated region fallthrough
CT: control target
= control target key end

     0   :  { %vm41_vm0 = vcmask 64512   ;;  %vm130_vm1 = vcmask 1041408   ;;  %vm123_vm2 = vcmask 211968   ;;  %vm632_vm3 = vmmov 1   ;;  %s774_s3 = inlined_call_operand.vmem [shape: f32[8,32], index: 3, kind: input, shape index: {}]   ;;  %s775_s1 = inlined_call_operand.vmem [shape: f32[16,8], index: 1, kind: input, shape index: {}]   ;;  %s776_s2 = inlined_call_operand.vmem [shape: f32[26,32], index: 2, kind: input, shape index: {}]   ;;  %s777_s0 = inlined_call_operand.vmem [shape: f32[16,26], index: 0, kind: input, shape index: {}]   ;;  %s778_s5 = inlined_call_operand.vmem [shape: f32[32,3], index: 5, kind: input, shape index: {}]   ;;  %s779_s7 = inlined_call_operand.vmem [shape: f32[26,9], index: 7, kind: input, shape index: {}]   ;;  %s780_s4 = inlined_call_operand.vmem [shape: f32[1,32], index: 4, kind: input, shape index: {}]   ;;  %s781_s8 = inlined_call_operand.vmem [shape: f32[9,9], index: 8, kind: input, shape index: {}]   ;;  %s782_s6 = inlined_call_operand.vmem [shape: f32[1,3], index: 6, kind: input, shape index: {}]   ;;  %s783_s9 = inlined_call_operand.vmem [shape: f32[16,12], index: 9, kind: output, shape index: {}]  }
   0x1   :  { %v40_v0 = vld [vmem:[%s774_s3] sm:$0xff]  ;;  %v35_v2 = vld [vmem:[%s775_s1 + $0x8] sm:$0xff]  ;;  %v38_v5 = vld [vmem:[%s776_s2 + $0x10] sm:$0xff]  ;;  %vm229_vm5 = vcmask 261120   ;;  %vm404_vm6 = vcmask 1040384   ;;  %vm397_vm8 = vcmask 72704  }
   0x2   :  { %v34_v1 = vld [vmem:[%s775_s1] sm:$0xff]  ;;  %545 = vmatprep.subr.mxu0 %v40_v0  ;;  %v37_v4 = vld [vmem:[%s776_s2 + $0x8] sm:$0xff]  ;;  %v39_v7 = vld [vmem:[%s776_s2 + $0x18] sm:$0x3]  ;;  %vm495_vm9 = vcmask 23552   ;;  %vm498_vm10 = vcmask 97280  }
   0x3   :  { %547 = vmatprep.mubr.msk.f32.mxu0 %vm41_vm0, %v34_v1  ;;  %v36_v3 = vld [vmem:[%s776_s2] sm:$0xff]  ;;  %546 = vmatpush3.msra.mxu0 %v40_v0  ;;  %v594_v9 = vpack.c.bf16 %v39_v7, %v38_v5  ;;  %vm712_vm4 = vmpackc.low %vm130_vm1, %vm632_vm3  ;;  %v219_v12 = vld [vmem:[%s778_s5 + $0x8] sm:$0xff] }
   0x4   :  { %v590_v6 = vpack.c.bf16 %v37_v4, %v36_v3  ;;  %v32_v8 = vld [vmem:[%s777_s0] sm:$0xff]  ;;  %548 = vmatmul.mubr.msk.f32.vlgmr.msra.gmra.mrb[0].mxu0 %vm41_vm0, %v35_v2  ;;  %v33_v14 = vld [vmem:[%s777_s0 + $0x8] sm:$0xff]  ;;  %v220_v15 = vld [vmem:[%s778_s5 + $0x10] sm:$0xff] }
   0x5   :  { %v218_v11 = vld [vmem:[%s778_s5] sm:$0xff]  ;;  %558 = vmatprep.mubr.msk.f32.mxu0 %vm123_vm2, %v32_v8  ;;  %v221_v16 = vld [vmem:[%s778_s5 + $0x18] sm:$0xff]  ;;  %v312_v19 = vld [vmem:[%s779_s7 + $0x8] sm:$0xff] }
   0x6   :  { %591 = vmatprep.subr.bf16.mxu0 %v590_v6  ;;  %v600_v13 = vpack.c.bf16 %v219_v12, %v218_v11  ;;  %v604_v17 = vpack.c.bf16 %v221_v16, %v220_v15  ;;  %v311_v18 = vld [vmem:[%s779_s7] sm:$0xff]  ;;  %v313_v23 = vld [vmem:[%s779_s7 + $0x10] sm:$0xff]  ;;  %v314_v24 = vld [vmem:[%s779_s7 + $0x18] sm:$0x3] }
   0x7   :  { %593 = vmatpush3.bf16.msra.mxu0 %v590_v6  ;;  %v608_v20 = vpack.c.bf16 %v312_v19, %v311_v18  ;;  %v510_v21 = vld [vmem:[%s780_s4] ss:$0 sm:$0xff]  ;;  %v612_v28 = vpack.c.bf16 %v314_v24, %v313_v23  ;;  %v396_v30 = vld [vmem:[%s781_s8 + $0x8] sm:$0x1]  ;;  %vm619_vm7 = vmpackc.low %vm404_vm6, %vm632_vm3 }
   0x8   :  { %596 = vmatprep.subr.msk.bf16.mxu0 %vm712_vm4, %v594_v9  ;;  %601 = vmatprep.subr.bf16.mxu1 %v600_v13  ;;  %v395_v29 = vld [vmem:[%s781_s8] sm:$0xff]  ;;  %s633_s8 = smov 3  }
   0x9   :  { %603 = vmatpush3.bf16.msra.mxu1 %v600_v13  ;;  %v618_v31 = vpack.c.bf16 %v396_v30, %v395_v29  ;;  %v511_v46 = vld [vmem:[%s782_s6] ss:$0 sm:$0xff] }
   0xa   :  { %605 = vmatprep.subr.bf16.mxu1 %v604_v17 }
   0xb   :  { %599 = vmatpush3.bf16.msk.msra.mxu0 %vm712_vm4, %v594_v9 }
   0xc   :  { %620 = vmatprep.subr.msk.bf16.mxu0 %vm619_vm7, %v618_v31 }
   0xd   :  { %607 = vmatpush3.bf16.msra.mxu1 %v604_v17 }
   0xe   :  { %559 = vmatmul.mubr.msk.f32.vlgmr.msra.gmra.mrb[0].mxu0 %vm123_vm2, %v33_v14  ;;  %609 = vmatprep.subr.bf16.mxu1 %v608_v20 }
   0xf   :  { %623 = vmatpush3.bf16.msk.msra.mxu0 %vm619_vm7, %v618_v31 }
  0xe1   :  { %v560_v22 = vpop.f32.mrb[0].mxu0 }
  0xe2   :  { %v200_v25 = vpop.f32.mrb[1].mxu0  ;;  %v217_v27 = vadd.f32 %v560_v22, %v510_v21 }
  0xe3   :  { %v216_v26 = vadd.f32 %v510_v21, %v200_v25 }
  0xe5   :  { %569 = vmatprep.mubr.msk.f32.mxu1 %vm229_vm5, %v216_v26 }
  0xe6   :  { %570 = vmatmul.mubr.msk.f32.vlgmr.msra.gmra.mrb[0].mxu1 %vm229_vm5, %v217_v27 }
  0xe7   :  { %611 = vmatpush3.bf16.msra.mxu1 %v608_v20  ;;  %580 = vmatprep.mubr.msk.f32.mxu1 %vm123_vm2, %v32_v8 }
  0xe8   :  { %614 = vmatprep.subr.msk.bf16.mxu1 %vm712_vm4, %v612_v28 }
  0xeb   :  { %617 = vmatpush3.bf16.msk.msra.mxu1 %vm712_vm4, %v612_v28 }
  0xee   :  { %581 = vmatmul.mubr.msk.f32.vlgmr.msra.gmra.mrb[2].mxu1 %vm123_vm2, %v33_v14 }
 0x1b9   :  { %v571_v32 = vpop.f32.mrb[0].mxu1 }
 0x1ba   :  { %v302_v33 = vpop.f32.mrb[1].mxu1  ;;  %v308_v50 = vadd.f32 %v571_v32, %v511_v46 }
 0x1bb   :  { %v303_v47 = vadd.f32 %v511_v46, %v302_v33 }
 0x1c1   :  { %v582_v34 = vpop.f32.mrb[2].mxu1 }
 0x1c2   :  { %v384_v35 = vpop.f32.mrb[3].mxu1  ;;  %v394_v37 = vmul.f32 %v582_v34, %v582_v34 }
 0x1c3   :  { %v393_v36 = vmul.f32 %v384_v35, %v384_v35 }
 0x1c5   :  { %587 = vmatprep.mubr.msk.f32.mxu0 %vm397_vm8, %v393_v36 }
 0x1c6   :  { %588 = vmatmul.mubr.msk.f32.vlgmr.msra.gmra.mrb[2].mxu0 %vm397_vm8, %v394_v37 }
 0x299   :  { %v589_v38 = vpop.f32.mrb[2].mxu0 }
 0x29a   :  { %v480_v39 = vadd.f32 1e-12, %v589_v38  ;;  %v474_v40 = vpop.f32.mrb[3].mxu0 }
 0x29b   :  { %v475_v41 = vadd.f32 1e-12, %v474_v40 }
 0x29c   :  { %628 = vrsqrt.f32 %v480_v39 }
 0x29d   :  { %630 = vrsqrt.f32 %v475_v41 }
 0x2a6   :  { %v629_v42 = vpop.eup %628 }
 0x2a7   :  { %v631_v43 = vpop.eup %630  ;;  %v486_v44 = vmul.f32 %v629_v42, %v582_v34 }
 0x2a8   :  { %v485_v45 = vmul.f32 %v631_v43, %v384_v35 }
 0x2aa   :  { %489 = vrot.lane.b32.xlu0 %v485_v45, %s633_s8 }
 0x2ae   :  { %491 = vrot.lane.b32.xlu0 %v486_v44, %s633_s8 }
 0x31c   :  { %v490_v48 = vpop.permute.xlu0 %489 }
 0x31d   :  { %v496_v49 = vsel %vm495_vm9, %v303_v47, %v490_v48 }
 0x31e   :  { %499 = vst.msk [vmem:[%s783_s9] sm:$0xff] %vm498_vm10, %v496_v49 }
 0x320   :  { %v492_v51 = vpop.permute.xlu0 %491 }
 0x321   :  { %v497_v52 = vsel %vm495_vm9, %v308_v50, %v492_v51 }
 0x322   :  { %500 = vst.msk [vmem:[%s783_s9 + $0x8] sm:$0xff] %vm498_vm10, %v497_v52 }

</bundles_post_ra>
